<compile_context>
chip_gen: v7x
topology: tpu7x:2x2x1
jax: 0.10.0
libtpu: 0.0.40
codegen_flags: <defaults>
</compile_context>

<pallas_src>
import functools

import jax
import jax.numpy as jnp
import numpy as np
from jax.experimental import pallas as pl
from jax.experimental.pallas import tpu as pltpu


def _round_up(x, m):
    return ((x + m - 1) // m) * m


def fce_loss_kernel(pred_ref, teacher_ref, wt_ref, out_ref, *, batch, tile_b):
    i = pl.program_id(0)

    pred = pred_ref[...]                        # (TB, C) f32
    t = teacher_ref[...]                        # (TB, 1) i32
    w_t = wt_ref[...]                           # (TB, 1) f32  = per_cls_weights[teacher]
    TB, C = pred.shape

    # Fused mask: (not the true class) AND (pred > 0).  The per-row class
    # weight is applied on the (TB, 1) column after the lane reduction.
    col = jax.lax.broadcasted_iota(jnp.int32, (TB, C), 1)
    keep = (col != t) & (pred > 0.0)            # (TB, C) bool

    # head_softmax
    x_mx = jnp.max(pred, axis=1, keepdims=True)
    e = jnp.exp(pred - x_mx)
    e_masked = jnp.where(keep, e, 0.0)
    num = w_t * jnp.sum(e_masked, axis=1, keepdims=True)   # (TB, 1)
    den = jnp.sum(e, axis=1, keepdims=True)                 # (TB, 1)
    yk = num * pl.reciprocal(den, approx=False)

    log_terms = jnp.log(yk + 1e-7)              # (TB, 1)

    # Mask out padded rows of the last tile (batch is the true batch size).
    row = jax.lax.broadcasted_iota(jnp.int32, (TB, 1), 0) + i * tile_b
    valid = (row < batch).astype(jnp.float32)
    tile_sum = jnp.sum(log_terms * valid, keepdims=True)    # (1, 1)

    # Accumulate into the grid-resident output block; finalize on last step.
    @pl.when(i == 0)
    def _():
        out_ref[...] = jnp.zeros_like(out_ref)

    out_ref[...] += tile_sum

    @pl.when(i == pl.num_programs(0) - 1)
    def _():
        out_ref[...] = out_ref[...] * (1.0 / batch)


def fce_loss_alpha(pred, teacher, per_cls_weights, *, tile_b=None):
    """pred: (B, C) f32, teacher: (B,) i32, per_cls_weights: (C,) f32 -> scalar f32."""
    B, C = pred.shape
    pred = pred.astype(jnp.float32)
    teacher = teacher.astype(jnp.int32)
    w = per_cls_weights.astype(jnp.float32)

    # Hoist the w[teacher[i]] gather out of the kernel (cheap XLA gather).
    w_t = w[teacher].reshape(B, 1)
    t2d = teacher.reshape(B, 1)

    # Batch tile: multiple of 8 sublanes, capped so a double-buffered f32
    # (TB, C) tile comfortably fits VMEM on all generations (incl. v7x 64 MiB).
    if tile_b is None:
        tile_b = min(512, _round_up(B, 8))
    tile_b = max(8, _round_up(tile_b, 8))

    b_pad = _round_up(B, tile_b)
    if b_pad != B:
        pad = b_pad - B
        # Zero padding keeps exp()/log() finite; padded rows are masked out of
        # the sum inside the kernel.
        pred = jnp.pad(pred, ((0, pad), (0, 0)))
        t2d = jnp.pad(t2d, ((0, pad), (0, 0)))
        w_t = jnp.pad(w_t, ((0, pad), (0, 0)))

    grid = (b_pad // tile_b,)
    kernel = functools.partial(fce_loss_kernel, batch=B, tile_b=tile_b)

    out = pl.pallas_call(
        kernel,
        out_shape=jax.ShapeDtypeStruct((1, 1), jnp.float32),
        grid_spec=pltpu.PrefetchScalarGridSpec(
            num_scalar_prefetch=0,
            grid=grid,
            in_specs=[
                pl.BlockSpec((tile_b, C), lambda i: (i, 0)),   # pred tile
                pl.BlockSpec((tile_b, 1), lambda i: (i, 0)),   # teacher column
                pl.BlockSpec((tile_b, 1), lambda i: (i, 0)),   # w[teacher] column
            ],
            out_specs=pl.BlockSpec((1, 1), lambda i: (0, 0)),  # resident accumulator
        ),
        compiler_params=pltpu.CompilerParams(
            # Shared accumulator across the batch axis -> must be sequential.
            dimension_semantics=("arbitrary",),
        ),
    )(pred, t2d, w_t)
    return out[0, 0]


def make_per_cls_weights(cls_num):
    # Reproduces the (buggy-looking but intentional) __init__ exactly:
    # only the LAST iteration's w survives (append is outside the loop).
    cls_num = np.array(cls_num)
    for i in range(len(cls_num)):
        w = np.where(np.array(cls_num[i]) < cls_num, 1, 0)
    return jnp.asarray(w, dtype=jnp.float32)     # shape (C,)


def reference_fce_loss(pred, teacher, w):
    # pure-JAX reference for validation
    B, C = pred.shape
    onehot = jnp.eye(C, dtype=jnp.float32)[teacher]
    w_t = w[teacher][:, None]
    mask = (1.0 - onehot) * w_t * (pred > 0).astype(jnp.float32)
    e = jnp.exp(pred - jnp.max(pred, axis=1, keepdims=True))
    yk = jnp.sum(e * mask, axis=1) / jnp.sum(e, axis=1)
    return jnp.mean(jnp.log(yk + 1e-7))


if __name__ == "__main__":
    n_classes = 10
    cls_num = [5000, 4000, 3000, 2000, 1500, 1000, 800, 600, 400, 200]
    per_cls_weights = make_per_cls_weights(cls_num)

    key = jax.random.PRNGKey(0)

    # Case 1: small, exact tile (batch=8, C=10).
    kp, kt, key = jax.random.split(key, 3)
    pred = jax.random.normal(kp, (8, n_classes), dtype=jnp.float32)
    teacher = jax.random.randint(kt, (8,), 0, n_classes, dtype=jnp.int32)
    loss = jax.block_until_ready(fce_loss_alpha(pred, teacher, per_cls_weights))
    ref = reference_fce_loss(pred, teacher, per_cls_weights)
    assert jnp.allclose(loss, ref, rtol=1e-5, atol=1e-5), (loss, ref)

    # Case 2: batch not a multiple of the tile -> exercises grid + padding path.
    kp, kt, key = jax.random.split(key, 3)
    pred2 = jax.random.normal(kp, (37, n_classes), dtype=jnp.float32)
    teacher2 = jax.random.randint(kt, (37,), 0, n_classes, dtype=jnp.int32)
    loss2 = jax.block_until_ready(
        fce_loss_alpha(pred2, teacher2, per_cls_weights, tile_b=16))
    ref2 = reference_fce_loss(pred2, teacher2, per_cls_weights)
    assert jnp.allclose(loss2, ref2, rtol=1e-5, atol=1e-5), (loss2, ref2)

    print("KERNEL_OK")
</pallas_src>

<mosaic_0001>
module attributes {stable_mosaic.version = 11 : i64} {
  func.func @fce_loss_kernel(%arg0: i32, %arg1: memref<8x10xf32, #tpu.memory_space<vmem>>, %arg2: memref<8x1xi32, #tpu.memory_space<vmem>>, %arg3: memref<8x1xf32, #tpu.memory_space<vmem>>, %arg4: memref<1x1xf32, #tpu.memory_space<vmem>>) attributes {dimension_semantics = [#tpu.dimension_semantics<arbitrary>], iteration_bounds = array<i64: 1>, scalar_prefetch = 0 : i64, scratch_operands = 0 : i64, tpu.core_type = #tpu.core_type<tc>, window_params = [{transform_indices = @transform_0, window_bounds = array<i64: 8, 10>}, {transform_indices = @transform_1, window_bounds = array<i64: 8, 1>}, {transform_indices = @transform_2, window_bounds = array<i64: 8, 1>}, {pipeline_mode = #tpu.pipeline_mode<synchronous>, transform_indices = @transform_3, window_bounds = array<i64: 1, 1>}]} {
    %c0 = arith.constant 0 : index
    %c0_0 = arith.constant 0 : index
    %0 = vector.load %arg1[%c0, %c0_0] : memref<8x10xf32, #tpu.memory_space<vmem>>, vector<8x10xf32>
    %c0_1 = arith.constant 0 : index
    %c0_2 = arith.constant 0 : index
    %1 = vector.load %arg2[%c0_1, %c0_2] : memref<8x1xi32, #tpu.memory_space<vmem>>, vector<8x1xi32>
    %c0_3 = arith.constant 0 : index
    %c0_4 = arith.constant 0 : index
    %2 = vector.load %arg3[%c0_3, %c0_4] : memref<8x1xf32, #tpu.memory_space<vmem>>, vector<8x1xf32>
    %3 = tpu.iota {dimensions = array<i32: 1>} : vector<8x10xi32>
    %4 = vector.broadcast %1 : vector<8x1xi32> to vector<8x10xi32>
    %5 = arith.cmpi ne, %3, %4 : vector<8x10xi32>
    %cst = arith.constant 0.000000e+00 : f32
    %6 = vector.broadcast %cst : f32 to vector<8x10xf32>
    %7 = arith.cmpf ogt, %0, %6 : vector<8x10xf32>
    %8 = arith.andi %5, %7 : vector<8x10xi1>
    %cst_5 = arith.constant dense<0xFF800000> : vector<8xf32>
    %9 = vector.multi_reduction <maximumf>, %0, %cst_5 [1] : vector<8x10xf32> to vector<8xf32>
    %10 = vector.shape_cast %9 : vector<8xf32> to vector<8x1xf32>
    %11 = vector.broadcast %10 : vector<8x1xf32> to vector<8x10xf32>
    %12 = arith.subf %0, %11 : vector<8x10xf32>
    %13 = math.exp %12 : vector<8x10xf32>
    %cst_6 = arith.constant 0.000000e+00 : f32
    %14 = vector.broadcast %cst_6 : f32 to vector<8x10xf32>
    %15 = arith.select %8, %13, %14 : vector<8x10xi1>, vector<8x10xf32>
    %cst_7 = arith.constant dense<0.000000e+00> : vector<8xf32>
    %16 = vector.multi_reduction <add>, %15, %cst_7 [1] : vector<8x10xf32> to vector<8xf32>
    %17 = vector.shape_cast %16 : vector<8xf32> to vector<8x1xf32>
    %18 = arith.mulf %2, %17 : vector<8x1xf32>
    %cst_8 = arith.constant dense<0.000000e+00> : vector<8xf32>
    %19 = vector.multi_reduction <add>, %13, %cst_8 [1] : vector<8x10xf32> to vector<8xf32>
    %20 = vector.shape_cast %19 : vector<8xf32> to vector<8x1xf32>
    %21 = tpu.reciprocal %20 : vector<8x1xf32> -> vector<8x1xf32>
    %22 = arith.mulf %18, %21 : vector<8x1xf32>
    %cst_9 = arith.constant 1.000000e-07 : f32
    %23 = vector.broadcast %cst_9 : f32 to vector<8x1xf32>
    %24 = arith.addf %22, %23 : vector<8x1xf32>
    %25 = math.log %24 : vector<8x1xf32>
    %26 = tpu.iota {dimensions = array<i32: 0>} : vector<8x1xi32>
    %c8_i32 = arith.constant 8 : i32
    %27 = arith.muli %arg0, %c8_i32 : i32
    %28 = vector.broadcast %27 : i32 to vector<8x1xi32>
    %29 = arith.addi %26, %28 : vector<8x1xi32>
    %c8_i32_10 = arith.constant 8 : i32
    %30 = vector.broadcast %c8_i32_10 : i32 to vector<8x1xi32>
    %31 = arith.cmpi slt, %29, %30 : vector<8x1xi32>
    %32 = arith.extui %31 : vector<8x1xi1> to vector<8x1xi32>
    %33 = arith.sitofp %32 : vector<8x1xi32> to vector<8x1xf32>
    %34 = arith.mulf %25, %33 : vector<8x1xf32>
    %35 = vector.shape_cast %34 : vector<8x1xf32> to vector<1x8x1xf32>
    %cst_11 = arith.constant dense<0.000000e+00> : vector<1xf32>
    %36 = vector.multi_reduction <add>, %35, %cst_11 [1, 2] : vector<1x8x1xf32> to vector<1xf32>
    %37 = vector.shape_cast %36 : vector<1xf32> to vector<1x1x1xf32>
    %38 = vector.extract %37[0, 0, 0] : f32 from vector<1x1x1xf32>
    %39 = vector.broadcast %38 : f32 to vector<1x1xf32>
    %c0_i32 = arith.constant 0 : i32
    %40 = arith.cmpi eq, %arg0, %c0_i32 : i32
    %41 = arith.extui %40 : i1 to i32
    %c0_i32_12 = arith.constant 0 : i32
    %42 = arith.cmpi ne, %41, %c0_i32_12 : i32
    scf.if %42 {
      %cst_19 = arith.constant 0.000000e+00 : f32
      %49 = vector.broadcast %cst_19 : f32 to vector<1x1xf32>
      %c0_20 = arith.constant 0 : index
      %c0_21 = arith.constant 0 : index
      %50 = vector.load %arg4[%c0_20, %c0_21] : memref<1x1xf32, #tpu.memory_space<vmem>>, vector<1x1xf32>
      tpu.vector_store %arg4[%c0_20, %c0_21], %49 {strides = array<i32>} : memref<1x1xf32, #tpu.memory_space<vmem>>, vector<1x1xf32>,
    } else {
    }
    %c0_13 = arith.constant 0 : index
    %c0_14 = arith.constant 0 : index
    %43 = vector.load %arg4[%c0_13, %c0_14] : memref<1x1xf32, #tpu.memory_space<vmem>>, vector<1x1xf32>
    %44 = arith.addf %43, %39 : vector<1x1xf32>
    %c0_15 = arith.constant 0 : index
    %c0_16 = arith.constant 0 : index
    %45 = vector.load %arg4[%c0_15, %c0_16] : memref<1x1xf32, #tpu.memory_space<vmem>>, vector<1x1xf32>
    tpu.vector_store %arg4[%c0_15, %c0_16], %44 {strides = array<i32>} : memref<1x1xf32, #tpu.memory_space<vmem>>, vector<1x1xf32>,
    %c0_i32_17 = arith.constant 0 : i32
    %46 = arith.cmpi eq, %arg0, %c0_i32_17 : i32
    %47 = arith.extui %46 : i1 to i32
    %c0_i32_18 = arith.constant 0 : i32
    %48 = arith.cmpi ne, %47, %c0_i32_18 : i32
    scf.if %48 {
      %c0_19 = arith.constant 0 : index
      %c0_20 = arith.constant 0 : index
      %49 = vector.load %arg4[%c0_19, %c0_20] : memref<1x1xf32, #tpu.memory_space<vmem>>, vector<1x1xf32>
      %cst_21 = arith.constant 1.250000e-01 : f32
      %50 = vector.broadcast %cst_21 : f32 to vector<1x1xf32>
      %51 = arith.mulf %49, %50 : vector<1x1xf32>
      %c0_22 = arith.constant 0 : index
      %c0_23 = arith.constant 0 : index
      %52 = vector.load %arg4[%c0_22, %c0_23] : memref<1x1xf32, #tpu.memory_space<vmem>>, vector<1x1xf32>
      tpu.vector_store %arg4[%c0_22, %c0_23], %51 {strides = array<i32>} : memref<1x1xf32, #tpu.memory_space<vmem>>, vector<1x1xf32>,
    } else {
    }
    return
  }
  func.func @transform_0(%arg0: i32) -> (i32, i32) {
    %c0_i32 = arith.constant 0 : i32
    %c0_i32_0 = arith.constant 0 : i32
    return %arg0, %c0_i32 : i32, i32
  }
  func.func @transform_1(%arg0: i32) -> (i32, i32) {
    %c0_i32 = arith.constant 0 : i32
    %c0_i32_0 = arith.constant 0 : i32
    return %arg0, %c0_i32 : i32, i32
  }
  func.func @transform_2(%arg0: i32) -> (i32, i32) {
    %c0_i32 = arith.constant 0 : i32
    %c0_i32_0 = arith.constant 0 : i32
    return %arg0, %c0_i32 : i32, i32
  }
  func.func @transform_3(%arg0: i32) -> (i32, i32) {
    %c0_i32 = arith.constant 0 : i32
    %c0_i32_0 = arith.constant 0 : i32
    %c0_i32_1 = arith.constant 0 : i32
    return %c0_i32, %c0_i32_0 : i32, i32
  }
}

</mosaic_0001>

<bundles_post_ra>
// kernel: tpu_custom_call.1
= control target key start
LH: loop header
LB: loop body
LE: loop exit
PB: predicated region body
PF: predicated region fallthrough
CT: control target
= control target key end

     0   :  { %vm26_vm0 = vcmask 80896   ;;  %s183_s0 = inlined_call_operand.vmem [shape: f32[8,10], index: 0, kind: input, shape index: {}]   ;;  %s184_s1 = inlined_call_operand.vmem [shape: s32[8,1], index: 1, kind: input, shape index: {}]   ;;  %s185_s2 = inlined_call_operand.vmem [shape: f32[8,1], index: 2, kind: input, shape index: {}]   ;;  %s186_s3 = inlined_call_operand.hbm [shape: f32[1,1], index: 3, kind: output, shape index: {}]  }
   0x1   :  { %v15_v0 = vld [vmem:[%s183_s0] sm:$0xff] }
   0x2   :  { %8 = vsyncpa [#allocation3], 0  ;;  %v27_v1 = vsel %vm26_vm0, %v15_v0, -inf  ;;  %v133_v2 = vmov 0   ;;  %v16_v3 = vld [vmem:[%s184_s1] sm:$0xff]  ;;  %v18_v7 = vlaneseq  ;;  %vm24_vm2 = vcmp.gt.f32.partialorder %v15_v0, 0.0 }
   0x3   :  { %102 = vset.pattern.permute.xlu0 %v133_v2  ;;  %v17_v15 = vld [vmem:[%s185_s2] sm:$0xff]  ;;  %vm55_vm4 = vcmask 7168   ;;  %vm71_vm5 = vcmask 0   ;;  %v134_v24 = vmov 0.0   ;;  %s135_s16 = smov [#allocation2]  }
   0x4   :  { %28 = vmax.xlane.f32.xlu0 %v27_v1  ;;  %v19_v8 = vand.u32 127, %v18_v7  ;;  %72 = vst.msk [vmem:[#allocation2] sm:$0x1] %vm71_vm5, %v134_v24  ;;  %s89_s17 = sshll.u32 %s135_s16, 4  ;;  %s90_s17 = int_to_ptr.vmem [resolvable:$true] %s89_s17 }
   0x5   :  { %s109_s18 = scalar_lea.vmem %s90_s17, 16  ;;  %s113_s19 = scalar_lea.vmem %s90_s17, 32 }
   0x6   :  { %p110_p0 = scmp.ne.s32.totalorder %s90_s17, %s109_s18  ;;  %p114_p1 = scmp.lt.s32.totalorder %s90_s17, %s90_s17 }
   0x7   :  { %p115_p2 = scmp.lt.s32.totalorder %s113_s19, %s109_s18 }
   0x9   :  { %p116_p3 = por %p115_p2, %p114_p1 }
   0xb   :  { %v73_v32 = vld [vmem:[#allocation2] sm:$0x1]  ;;  %p117_p4 = pnand %p116_p3, %p110_p0 }
  0x1a   :  { %21 = vperm.xlu0 %102, %v16_v3  }
  0x91   :  { %v29_v4 = vpop.xlane.xlu0 %28 }
  0x92   :  { %v30_v5 = vsub.f32 %v15_v0, %v29_v4 }
  0x94   :  { %v31_v6 = vmul.f32 1.442695, %v30_v5 }
  0x96   :  { %103 = vpow2.f32 %v31_v6 }
  0x99   :  { %v22_v9 = vpop.permute.xlu0 %21 }
  0x9a   :  { %vm23_vm1 = vcmp.ne.s32.totalorder %v19_v8, %v22_v9 }
  0x9b   :  { %vm25_vm3 = vmand %vm23_vm1, %vm24_vm2 }
  0xa0   :  { %v104_v10 = vpop.eup %103 }
  0xa1   :  { %v38_v11 = vsel %vm26_vm0, %v104_v10, 0.0  ;;  %v33_v12 = vsel %vm25_vm3, %v104_v10, 0.0 }
  0xa2   :  { %39 = vadd.xlane.f32.xlu1 %v38_v11  ;;  %v34_v13 = vsel %vm26_vm0, %v33_v12, 0.0 }
  0xa6   :  { %35 = vadd.xlane.f32.xlu1 %v34_v13 }
 0x12f   :  { %v40_v14 = vpop.xlane.xlu1 %39 }
 0x130   :  { %105 = vrcp.f32 %v40_v14 }
 0x133   :  { %v36_v16 = vpop.xlane.xlu1 %35 }
 0x134   :  { %v37_v17 = vmul.f32 %v36_v16, %v17_v15 }
 0x13a   :  { %v106_v18 = vpop.eup %105 }
 0x13b   :  { %v42_v19 = vmul.f32 %v106_v18, %v37_v17 }
 0x13d   :  { %v43_v20 = vadd.f32 1e-07, %v42_v19 }
 0x13f   :  { %107 = vlog2.f32 %v43_v20 }
 0x149   :  { %v108_v21 = vpop.eup %107 }
 0x14a   :  { %v45_v22 = vmul.f32 0.6931472, %v108_v21 }
 0x14c   :  { %v56_v23 = vsel %vm55_vm4, %v45_v22, 0.0 }
 0x14d   :  { %57 = vadd.xlane.f32.xlu1 %v56_v23 }
 0x1da   :  { %v58_v25 = vpop.xlane.xlu1 %57 }
 0x1db   :  { %v59_v26 = vrot.slane %v58_v25, 4 }
 0x1dd   :  { %v60_v27 = vadd.f32 %v59_v26, %v58_v25 }
 0x1df   :  { %v61_v28 = vrot.slane %v60_v27, 2 }
 0x1e1   :  { %v62_v29 = vadd.f32 %v61_v28, %v60_v27 }
 0x1e3   :  { %v63_v30 = vrot.slane %v62_v29, 1 }
 0x1e5   :  { %v64_v31 = vadd.f32 %v63_v30, %v62_v29 }
 0x1e7   :  { %97 = vpush %v64_v31 }
 0x218   :  { %s98_s2 = spop %97 }
 0x219   :  { %v66_v33 = vstv %s98_s2 }
 0x21a   :  { %v74_v34 = vadd.f32 %v73_v32, %v66_v33 }
 0x21c   :  { %76 = vst.msk [vmem:[#allocation2] sm:$0x1] %vm71_vm5, %v74_v34 }
 0x223   :  { %v80_v35 = vld [vmem:[#allocation2] sm:$0x1] }
 0x224   :  { %v81_v36 = vmul.f32 0.125, %v80_v35 }
 0x226   :  { %82 = vst.msk [vmem:[#allocation2] sm:$0x1] %vm71_vm5, %v81_v36 }
 0x227   :  { %120 = shalt.err (!%p117_p4)
}
 0x228   :  { %s121_s22 = scalar_lea.hbm %s186_s3, 16 }
 0x229   :  { %p122_p5 = scmp.ne.s32.totalorder %s186_s3, %s121_s22  ;;  %p125_p6 = scmp.lt.u32.totalorder %s121_s22, %s186_s3 }
 0x22b   :  { %p127_p7 = pnand %p125_p6, %p122_p5 }
 0x22d   :  { %130 = shalt.err (!%p127_p7)
}
 0x22e   :  { %92 = dma.vmem_to_hbm [thread:$0]  %s90_s17, 16, %s186_s3, [#allocation3]  }
 0x22f   :  { %131 = dma.done.wait [#allocation3], 16  }
 0x230   :  { %132 = vsyncadd [#allocation3], 4294967280 }
 0x231   :  { %96 = vsyncpa [#allocation3], 1 }

</bundles_post_ra>
